<compile_context>
chip_gen: v7x
topology: tpu7x:2x2x1
jax: 0.10.0
libtpu: 0.0.40
codegen_flags: <defaults>
</compile_context>

<pallas_src>
import jax
import jax.numpy as jnp
from jax.experimental import pallas as pl
from jax.experimental.pallas import tpu as pltpu


def _apply_kernel(pt_ref, x_ref, o_ref):
    """One (sample, spatial-tile) step of Y = P^T @ X.

    pt_ref: (C, C) float32, already transposed (plain MXU matmul, no transpose
            per grid step); x_ref / o_ref: (C, hw_tile) in the input dtype.
    """
    pt = pt_ref[...].astype(x_ref.dtype)
    o_ref[...] = jnp.dot(
        pt, x_ref[...], preferred_element_type=jnp.float32
    ).astype(o_ref.dtype)


def _vmem_capacity_bytes():
    try:
        return int(pltpu.get_tpu_info().vmem_capacity_bytes)
    except Exception:
        return 64 << 20  # conservative fallback: v7x per-TensorCore VMEM


def _round_up(x, m):
    return ((x + m - 1) // m) * m


def _pick_hw_tile(hw, c, itemsize, buffer_budget_bytes, n):
    """Lane (H*W) tile for the P^T @ X kernel.

    Largest 128-multiple tile whose double-buffered X-in + Y-out footprint fits
    the budget; a partial masked last block is legal because the grid uses
    pl.cdiv (no divisibility requirement, no full-extent fallback).  If a
    single grid step would cover the whole problem, split it so the 'parallel'
    axes have >= 2 steps (v7x megacore utilization).
    """
    per_lane = 4 * c * itemsize  # 2 buffers x (X block + Y block) per lane
    max_fit = max(buffer_budget_bytes // per_lane, 128)

    if hw <= max_fit:
        tile = hw  # full extent is always a legal block shape
    else:
        tile = max((max_fit // 128) * 128, 128)

    # Guarantee >= 2 grid steps so both v7x TensorCores get work.
    if n * pl.cdiv(hw, tile) < 2 and hw >= 256:
        tile = _round_up(pl.cdiv(hw, 2), 128)
    return tile


def inspiration_forward(x, weight, G):
    """x: (N, C, H, W); weight: (1, C, C); G: (B, C, C) with B in {1, N}."""
    N, C, H, W = x.shape
    HW = H * W
    B = G.shape[0]
    assert weight.shape == (1, C, C)
    assert G.shape == (B, C, C)
    assert B in (1, N), "G batch must be 1 (shared) or N (per-sample)"

    # ---- P^T = (weight @ G)^T, once, in f32, outside the spatial grid. ------
    # Tiny (B, C, C) matmul: plain XLA beats a dedicated Pallas launch here,
    # and pre-transposing removes any per-grid-step transpose from the kernel.
    # Keeping P^T in f32 avoids double rounding when X is bf16.
    p_t = jnp.transpose(
        jnp.matmul(weight.astype(jnp.float32), G.astype(jnp.float32)),
        (0, 2, 1),
    )

    # ---- Pallas kernel: Y[n, :, j-tile] = P^T @ X[n, :, j-tile] -------------
    vmem_cap = _vmem_capacity_bytes()
    itemsize = jnp.dtype(x.dtype).itemsize

    p_buf_bytes = 2 * C * C * 4  # resident P^T block, double-buffered, f32
    # ~3/8 of VMEM for streaming X/Y double buffers (~48 MiB on 128-MiB
    # v5e/v6e, ~24 MiB on 64-MiB v7x), minus the resident P^T.
    buffer_budget = max((3 * vmem_cap) // 8 - p_buf_bytes, 128 * 4 * C * itemsize)
    hw_tile = _pick_hw_tile(HW, C, itemsize, buffer_budget, N)
    # TODO(synk): very large C (>~2.5k f32) would additionally need C-tiling of
    # P^T to fit v7x's 64 MiB VMEM; not needed for typical MSG-Net sizes.

    vmem_limit = min(int(0.75 * vmem_cap), 112 << 20)

    x_flat = x.reshape(N, C, HW)

    if B == 1:
        p_index = lambda n, j: (0, 0, 0)  # shared P^T across the batch
    else:
        p_index = lambda n, j: (n, 0, 0)  # per-sample P^T

    out_flat = pl.pallas_call(
        _apply_kernel,
        out_shape=jax.ShapeDtypeStruct((N, C, HW), x.dtype),
        grid_spec=pltpu.PrefetchScalarGridSpec(
            num_scalar_prefetch=0,
            grid=(N, pl.cdiv(HW, hw_tile)),
            in_specs=[
                pl.BlockSpec((pl.Squeezed(), C, C), p_index),
                pl.BlockSpec((pl.Squeezed(), C, hw_tile), lambda n, j: (n, 0, j)),
            ],
            out_specs=pl.BlockSpec(
                (pl.Squeezed(), C, hw_tile), lambda n, j: (n, 0, j)
            ),
        ),
        compiler_params=pltpu.CompilerParams(
            dimension_semantics=("parallel", "parallel"),
            vmem_limit_bytes=vmem_limit,
        ),
    )(p_t, x_flat)

    return out_flat.reshape(N, C, H, W)


def _reference(x, weight, G):
    # Pure-JAX reference mirroring the PyTorch forward.
    N, C, H, W = x.shape
    P = jnp.matmul(weight, G)                     # (B, C, C)
    Pt = jnp.broadcast_to(jnp.transpose(P, (0, 2, 1)), (N, C, C))
    y = jnp.matmul(Pt, x.reshape(N, C, H * W))    # (N, C, HW)
    return y.reshape(N, C, H, W)


if __name__ == "__main__":
    key = jax.random.PRNGKey(0)
    k_x, k_w, k_g = jax.random.split(key, 3)

    N, C, H, W = 2, 32, 16, 16  # batch=2, channels=32, spatial=16x16

    x = jax.random.normal(k_x, (N, C, H, W), dtype=jnp.float32)
    # reset_parameters(): weight ~ U(0, 0.02)
    weight = jax.random.uniform(
        k_w, (1, C, C), dtype=jnp.float32, minval=0.0, maxval=0.02
    )
    # G is normally supplied via setTarget(); initialize deterministically here.
    G = jax.random.normal(k_g, (1, C, C), dtype=jnp.float32)

    y = inspiration_forward(x, weight, G)
    jax.block_until_ready(y)

    y_ref = _reference(x, weight, G)
    assert y.shape == x.shape
    assert jnp.allclose(y, y_ref, atol=1e-4, rtol=1e-4), "mismatch vs reference"

    print("KERNEL_OK")
</pallas_src>

<mosaic_0001>
module attributes {stable_mosaic.version = 11 : i64} {
  func.func @_apply_kernel(%arg0: i32, %arg1: i32, %arg2: memref<1x32x32xf32, #tpu.memory_space<vmem>>, %arg3: memref<1x32x256xf32, #tpu.memory_space<vmem>>, %arg4: memref<1x32x256xf32, #tpu.memory_space<vmem>>) attributes {dimension_semantics = [#tpu.dimension_semantics<parallel>, #tpu.dimension_semantics<parallel>], iteration_bounds = array<i64: 2, 1>, scalar_prefetch = 0 : i64, scratch_operands = 0 : i64, tpu.core_type = #tpu.core_type<tc>, window_params = [{pipeline_mode = #tpu.pipeline_mode<synchronous>, transform_indices = @transform_0, window_bounds = array<i64: 1, 32, 32>}, {transform_indices = @transform_1, window_bounds = array<i64: 1, 32, 256>}, {transform_indices = @transform_2, window_bounds = array<i64: 1, 32, 256>}]} {
    %c0 = arith.constant 0 : index
    %c0_0 = arith.constant 0 : index
    %c0_1 = arith.constant 0 : index
    %0 = vector.load %arg2[%c0, %c0_0, %c0_1] : memref<1x32x32xf32, #tpu.memory_space<vmem>>, vector<1x32x32xf32>
    %1 = vector.shape_cast %0 : vector<1x32x32xf32> to vector<32x32xf32>
    %c0_2 = arith.constant 0 : index
    %c0_3 = arith.constant 0 : index
    %c0_4 = arith.constant 0 : index
    %2 = vector.load %arg3[%c0_2, %c0_3, %c0_4] : memref<1x32x256xf32, #tpu.memory_space<vmem>>, vector<1x32x256xf32>
    %3 = vector.shape_cast %2 : vector<1x32x256xf32> to vector<32x256xf32>
    %cst = arith.constant dense<0.000000e+00> : vector<32x256xf32>
    %4 = tpu.matmul %1, %3, %cst {dimension_numbers = #tpu.dot_dimension_numbers<[1], [0], [0], [1], [0, 0, 1, 1], [], []>} : vector<32x32xf32>, vector<32x256xf32>, vector<32x256xf32> -> vector<32x256xf32>
    %c0_5 = arith.constant 0 : index
    %c0_6 = arith.constant 0 : index
    %c0_7 = arith.constant 0 : index
    %5 = vector.load %arg4[%c0_5, %c0_6, %c0_7] : memref<1x32x256xf32, #tpu.memory_space<vmem>>, vector<1x32x256xf32>
    %6 = vector.shape_cast %5 : vector<1x32x256xf32> to vector<32x256xf32>
    %7 = vector.shape_cast %4 : vector<32x256xf32> to vector<1x32x256xf32>
    tpu.vector_store %arg4[%c0_5, %c0_6, %c0_7], %7 {strides = array<i32>} : memref<1x32x256xf32, #tpu.memory_space<vmem>>, vector<1x32x256xf32>,
    return
  }
  func.func @transform_0(%arg0: i32, %arg1: i32) -> (i32, i32, i32) {
    %c0_i32 = arith.constant 0 : i32
    %c0_i32_0 = arith.constant 0 : i32
    %c0_i32_1 = arith.constant 0 : i32
    %c0_i32_2 = arith.constant 0 : i32
    return %c0_i32, %c0_i32_0, %c0_i32_1 : i32, i32, i32
  }
  func.func @transform_1(%arg0: i32, %arg1: i32) -> (i32, i32, i32) {
    %c0_i32 = arith.constant 0 : i32
    %c0_i32_0 = arith.constant 0 : i32
    return %arg0, %c0_i32, %arg1 : i32, i32, i32
  }
  func.func @transform_2(%arg0: i32, %arg1: i32) -> (i32, i32, i32) {
    %c0_i32 = arith.constant 0 : i32
    %c0_i32_0 = arith.constant 0 : i32
    return %arg0, %c0_i32, %arg1 : i32, i32, i32
  }
}

</mosaic_0001>

<bundles_post_ra>
// kernel: tpu_custom_call.1
= control target key start
LH: loop header
LB: loop body
LE: loop exit
PB: predicated region body
PF: predicated region fallthrough
CT: control target
= control target key end

     0   :  { %7 = vsyncpa [#allocation3], 0  ;;  %s943_s0 = inlined_call_operand.hbm [shape: f32[1,32,32], index: 0, kind: input, shape index: {}]   ;;  %s944_s1 = inlined_call_operand.hbm [shape: f32[2,32,256], index: 1, kind: input, shape index: {}]   ;;  %s945_s2 = inlined_call_operand.hbm [shape: f32[2,32,256], index: 2, kind: output, shape index: {}]  }
   0x1   :  { %8 = vsyncpa [#allocation6], 0 }
   0x2   :  { %10 = vsyncpa [#allocation6 + $0x1], 0 }
   0x3   :  { %11 = vsyncpa [#allocation4], 0 }
   0x4   :  { %13 = vsyncpa [#allocation4 + $0x1], 0  ;;  %s720_s9 = smov 0   ;;  %s722_s10 = smov 0  }
   0x5   :  { %s724_s11 = smov 0   ;;  %s726_s12 = smov 0  }
   0x6   :  { %s728_s13 = smov 0   ;;  %s730_s14 = smov 0  }
   0x7 LB: > { %s434_s15 = sadd.s32 4294967295, %s693_s14   ;;  %s435_s16 = sadd.s32 4294967294, %s693_s14   ;;  %s693_s14 = sphi %s730_s14, %s19_s14   ;;  %s689_s13 = sphi %s728_s13, %s969_s13   ;;  %s685_s12 = sphi %s726_s12, %s968_s12   ;;  %s681_s11 = sphi %s724_s11, %s967_s11   ;;  %s677_s10 = sphi %s722_s10, %s966_s10   ;;  %s673_s9 = sphi %s720_s9, %s965_s9  }
   0x8   : > { %p74_p0 = scmp.ne.s32.totalorder %s677_s10, %s673_s9  ;;  %p754_p1 = scmp.eq.s32.totalorder %s434_s15, 0 }
   0x9   : > { %p758_p2 = scmp.eq.s32.totalorder %s434_s15, 1  ;;  %p106_p3 = scmp.eq.s32.totalorder %s435_s16, 1 }
   0xa   : > { %s950_s17 = scalar_select %p754_p1, 1, 0 }
   0xb   : > { %s951_s18 = scalar_select %p758_p2, 1, 0 }
   0xc   : > { %p764_p4 = por %p754_p1, %p74_p0  ;;  %p436_p5 = scmp.ge.s32.totalorder %s693_s14, 1 }
   0xd   : > { %p769_p6 = por %p106_p3, %p74_p0  ;;  %p113_p7 = scmp.lt.s32.totalorder %s693_s14, 3 }
   0xe   : > { %s952_s19 = scalar_select %p764_p4, 1, 0 }
   0xf   : > { %s953_s20 = scalar_select %p769_p6, 1, 0 }
  0x10   : > { %p774_p8 = pnand %p436_p5, %p113_p7  ;;  %s695_s22 = smov [#allocation2]  }
  0x11   : > { %s125_s23 = sshll.u32 %s695_s22, 4  ;;  %s31_s25 = sadd.s32 1, %s689_s13  ;;  %s126_s23 = int_to_ptr.vmem [resolvable:$true] %s125_s23 }
  0x12   : > { %s954_s21 = scalar_select %p774_p8, 1, 0 }
  0x13   : > { %p477_p9 = pneg %p774_p8  ;;  %s549_s28 = scalar_lea.hbm %s943_s0, 512 }
  0x14   : > { %p550_p12 = scmp.ne.s32.totalorder %s943_s0, %s549_s28  ;;  %p556_p5 = scmp.lt.u32.totalorder %s549_s28, %s943_s0 }
  0x15   : > { %p783_p11 = pnand %p477_p9, %p754_p1 }
  0x17   : > { %p551_p13 = pneg %p783_p11 }
  0x19   : > { %p552_p0 = pnand %p551_p13, %p550_p12 }
  0x1b   : > { %p553_p3 = pneg %p552_p0 }
  0x1d   : > { %p558_p7 = pnand %p556_p5, %p553_p3 }
  0x1f   : > { %561 = shalt.err (!%p558_p7)
}
  0x20   : > { %s562_s5 = scalar_lea.vmem %s126_s23, 512  ;;  %p570_p4 = scmp.lt.s32.totalorder %s126_s23, %s126_s23 }
  0x21   : > { %p563_p9 = scmp.ne.s32.totalorder %s126_s23, %s562_s5  ;;  %p571_p1 = scmp.lt.s32.totalorder %s562_s5, %s562_s5 }
  0x23   : > { %p565_p10 = pnand %p563_p9, %p551_p13  ;;  %p572_p8 = por %p571_p1, %p570_p4 }
  0x25   : > { %p566_p6 = pneg %p565_p10 }
  0x27   : > { %p573_p2 = pnand %p572_p8, %p566_p6 }
  0x29   : > { %576 = shalt.err (!%p573_p2)
}
  0x2a   : > { %s696_s6 = smov 128   ;;  %s697_s7 = smov 8  }
  0x2b   : > { %480 = dma.hbm_to_vmem [thread:$0]  (!%p783_p11), %s943_s0, 512, %s126_s23, [#allocation3], %s696_s6, %s696_s6, %s697_s7  }
  0x2c   : > { %p33_p1 = scmp.ge.s32.totalorder %s31_s25, 2  ;;  %s61_s16 = sadd.s32 1, %s681_s11 }
  0x2d   : > { %p68_p2 = scmp.ne.s32.totalorder %s681_s11, %s677_s10  ;;  %p69_p4 = scmp.eq.s32.totalorder %s693_s14, 0 }
  0x2e   : > { %s971_s25 = smov (%p33_p1, %s31_s25), 0  ;;  %p957_p8 = scmp.ne.s32.totalorder %s951_s18, 0 }
  0x2f   : > { %p810_p6 = por %p69_p4, %p68_p2  ;;  %s56_s24 = ssub.s32 %s689_s13, %s971_s25 }
  0x30   : > { %p816_p10 = por %p957_p8, %p68_p2  ;;  %p490_p12 = scmp.lt.s32.totalorder %s693_s14, 2 }
  0x31   : > { %p59_p11 = scmp.eq.s32.totalorder %s56_s24, 0  ;;  %s139_s23 = sand.u32 1, %s681_s11  }
  0x32   : > { %s439_s27 = sshll.u32 %s139_s23, 6  ;;  %s455_s29 = sshll.u32 %s689_s13, 10 }
  0x33   : > { %s825_s28 = scalar_select %p59_p11, %s681_s11, %s61_s16  }
  0x34   : > { %s831_s4 = scalar_lea.hbm %s944_s1, %s455_s29  ;;  %s143_s18 = scalar_lea.vmem [#allocation5], %s439_s27 }
  0x35   : > { %s152_s5 = sshll.u32 %s143_s18, 4  ;;  %p837_p13 = pnand %p490_p12, %p810_p6  ;;  %s833_s5 = int_to_ptr.vmem [resolvable:$true] %s152_s5 }
  0x36   : > { %s841_s7 = scalar_lea.sflag [#allocation6], %s139_s23  ;;  %s577_s8 = scalar_lea.hbm %s831_s4, 1024 }
  0x37   : > { %p578_p0 = scmp.ne.s32.totalorder %s831_s4, %s577_s8  ;;  %p579_p3 = pneg %p837_p13 }
  0x38   : > { %s582_s22 = scalar_lea.hbm %s944_s1, 2048  ;;  %p583_p9 = scmp.lt.u32.totalorder %s831_s4, %s944_s1 }
  0x39   : > { %p580_p5 = pnand %p579_p3, %p578_p0  ;;  %p584_p1 = scmp.lt.u32.totalorder %s582_s22, %s577_s8 }
  0x3a   : > { %p586_p4 = scmp.lt.u32.totalorder %s577_s8, %s831_s4 }
  0x3b   : > { %p581_p7 = pneg %p580_p5  ;;  %p585_p2 = por %p584_p1, %p583_p9 }
  0x3d   : > { %p587_p6 = por %p586_p4, %p585_p2 }
  0x3f   : > { %p588_p8 = pnand %p587_p6, %p581_p7 }
  0x41   : > { %591 = shalt.err (!%p588_p8)
}
  0x42   : > { %s592_s23 = scalar_lea.vmem %s833_s5, 1024  ;;  %s698_s29 = smov [#allocation5]  }
  0x43   : > { %p593_p12 = scmp.ne.s32.totalorder %s833_s5, %s592_s23  ;;  %s597_s30 = sshll.u32 %s698_s29, 4  ;;  %s598_s30 = int_to_ptr.vmem [resolvable:$false] %s597_s30 }
  0x44   : > { %s599_s3 = scalar_lea.vmem %s598_s30, 2048  ;;  %p600_p5 = scmp.lt.s32.totalorder %s833_s5, %s598_s30 }
  0x45   : > { %p595_p11 = pnand %p593_p12, %p579_p3  ;;  %p601_p9 = scmp.lt.s32.totalorder %s599_s3, %s592_s23 }
  0x47   : > { %p596_p0 = pneg %p595_p11  ;;  %p602_p1 = por %p601_p9, %p600_p5 }
  0x49   : > { %p603_p2 = pnand %p602_p1, %p596_p0 }
  0x4b   : > { %606 = shalt.err (!%p603_p2)
}
  0x4c   : > { %s699_s18 = smov 256   ;;  %s700_s8 = smov 16  }
  0x4d   : > { %484 = dma.hbm_to_vmem [thread:$0]  (!%p837_p13), %s831_s4, 1024, %s833_s5, %s841_s7, %s699_s18, %s699_s18, %s700_s8  }
  0x4e   : > { %p960_p3 = scmp.ne.s32.totalorder %s954_s21, 0 }
  0x4f   : > { %p961_p7 = scmp.ne.s32.totalorder (!%p960_p3), %s950_s17, 0 }
  0x50   : > { %164 = sbr.rel (%p960_p3) target bundleno = 335 (0x14f), region = 28 }
  0x57   : > { %660 = dma.done.wait (%p961_p7), [#allocation3], 512  }
  0x58   : > { %662 = vsyncadd (%p961_p7), [#allocation3], 4294966784  ;;  %s876_s15 = sand.u32 1, %s677_s10   ;;  %p962_p13 = scmp.ne.s32.totalorder %s952_s19, 0 }
  0x59   : > { %s444_s16 = sshll.u32 %s876_s15, 6  ;;  %s171_s22 = scalar_lea.sflag [#allocation6], %s876_s15 }
  0x5a   : > { %s174_s4 = scalar_lea.vmem [#allocation5], %s444_s16 }
  0x5b   : > { %664 = dma.done.wait (%p962_p13), %s171_s22, 1024  }
  0x5c   : > { %666 = vsyncadd (%p962_p13), %s171_s22, 4294966272  ;;  %v701_v0 = vmov 0.0   ;;  %v202_v1 = vld [vmem:[%s174_s4 + $0x8] sm:$0xff]  ;;  %v204_v2 = vld [vmem:[%s174_s4 + $0x18] sm:$0xff]  ;;  %vm209_vm0 = vcmask 261120   ;;  %s194_s17 = scalar_lea.vmem [#allocation7], %s444_s16 }
  0x5d   : > { %286 = vmatprep.mubr.f32.mxu0 %v701_v0  ;;  %298 = vmatprep.mubr.f32.mxu1 %v701_v0  ;;  %v201_v3 = vld [vmem:[%s174_s4] sm:$0xff]  ;;  %v457_v4 = vpack.c.bf16 %v204_v2, %v202_v1  ;;  %v203_v5 = vld [vmem:[%s174_s4 + $0x10] sm:$0xff]  ;;  %v206_v6 = vld [vmem:[%s174_s4 + $0x28] sm:$0xff]  ;;  %s335_s19 = sshll.u32 %s194_s17, 4  ;;  %s456_s21 = sshll.u32 %s685_s12, 10  ;;  %s889_s19 = int_to_ptr.vmem [resolvable:$true] %s335_s19 }
  0x5e   : > { %v208_v7 = vld [vmem:[%s174_s4 + $0x38] sm:$0xff]  ;;  %v459_v8 = vpack.c.bf16 %v203_v5, %v201_v3  ;;  %v205_v10 = vld [vmem:[%s174_s4 + $0x20] sm:$0xff]  ;;  %v207_v11 = vld [vmem:[%s174_s4 + $0x30] sm:$0xff]  ;;  %s894_s7 = scalar_lea.hbm %s945_s2, %s456_s21  ;;  %s320_s12 = scalar_lea.sflag [#allocation4], %s876_s15 }
  0x5f   : > { %v461_v9 = vpack.c.bf16 %v208_v7, %v206_v6  ;;  %458 = vmatprep.subr.bf16.mxu0 %v457_v4  ;;  %465 = vmatprep.subr.bf16.mxu1 %v457_v4  ;;  %v463_v12 = vpack.c.bf16 %v207_v11, %v205_v10  ;;  %v197_v13 = vld [vmem:[#allocation2] sm:$0xff]  ;;  %v199_v14 = vld [vmem:[#allocation2 + $0x10] sm:$0xff]  ;;  %v198_v15 = vld [vmem:[#allocation2 + $0x8] sm:$0xff]  ;;  %s607_s24 = scalar_lea.vmem %s889_s19, 1024  ;;  %s702_s27 = smov [#allocation7]  }
  0x60   : > { %460 = vmatpush1.bf16.msra.mxu0 %v459_v8  ;;  %467 = vmatpush1.bf16.msra.mxu1 %v459_v8  ;;  %v200_v16 = vld [vmem:[#allocation2 + $0x18] sm:$0xff]  ;;  %p608_p4 = scmp.ne.s32.totalorder %s889_s19, %s607_s24  ;;  %s611_s23 = sshll.u32 %s702_s27, 4  ;;  %s612_s23 = int_to_ptr.vmem [resolvable:$false] %s611_s23 }
  0x61   : > { %462 = vmatprep.subr.bf16.mxu0 %v461_v9  ;;  %466 = vmatprep.subr.bf16.mxu1 %v461_v9  ;;  %s613_s29 = scalar_lea.vmem %s612_s23, 2048  ;;  %p614_p12 = scmp.lt.s32.totalorder %s889_s19, %s612_s23 }
  0x62   : > { %p609_p6 = pnand %p608_p4, %p816_p10  ;;  %p615_p11 = scmp.lt.s32.totalorder %s613_s29, %s607_s24 }
  0x64   : > { %464 = vmatpush1.bf16.msra.mxu0 %v463_v12  ;;  %468 = vmatpush1.bf16.msra.mxu1 %v463_v12  ;;  %p610_p8 = pneg %p609_p6  ;;  %p616_p0 = por %p615_p11, %p614_p12 }
  0x66   : > { %p617_p5 = pnand %p616_p0, %p610_p8 }
  0x67   : > { %446 = vmatmul.mubr.msk.f32.vlgmr.msra.gmra.mrb[0].mxu0 %vm209_vm0, %v197_v13  ;;  %448 = vmatmul.mubr.msk.f32.vlgmr.msra.gmra.mrb[0].mxu1 %vm209_vm0, %v199_v14 }
  0x68   : > { %292 = vmatprep.mubr.f32.mxu0 %v701_v0  ;;  %304 = vmatprep.mubr.f32.mxu1 %v701_v0 }
  0x6b   : > { %447 = vmatmul.mubr.msk.f32.gmra.mrb[2].mxu0 %vm209_vm0, %v198_v15  ;;  %449 = vmatmul.mubr.msk.f32.gmra.mrb[2].mxu1 %vm209_vm0, %v200_v16 }
 0x13a   : > { %v288_v17 = vpop.f32.mrb[0].mxu0  ;;  %v300_v18 = vpop.f32.mrb[0].mxu1 }
 0x13b   : > { %311 = vst [vmem:[%s194_s17] sm:$0xff] %v288_v17  ;;  %315 = vst [vmem:[%s194_s17 + $0x20] sm:$0xff] %v300_v18  ;;  %v290_v19 = vpop.f32.mrb[1].mxu0  ;;  %v302_v20 = vpop.f32.mrb[1].mxu1 }
 0x13c   : > { %312 = vst [vmem:[%s194_s17 + $0x8] sm:$0xff] %v290_v19  ;;  %316 = vst [vmem:[%s194_s17 + $0x28] sm:$0xff] %v302_v20 }
 0x13e   : > { %v294_v21 = vpop.f32.mrb[2].mxu0  ;;  %v306_v22 = vpop.f32.mrb[2].mxu1 }
 0x13f   : > { %313 = vst [vmem:[%s194_s17 + $0x10] sm:$0xff] %v294_v21  ;;  %317 = vst [vmem:[%s194_s17 + $0x30] sm:$0xff] %v306_v22  ;;  %v296_v23 = vpop.f32.mrb[3].mxu0  ;;  %v308_v24 = vpop.f32.mrb[3].mxu1 }
 0x140   : > { %314 = vst [vmem:[%s194_s17 + $0x18] sm:$0xff] %v296_v23  ;;  %318 = vst [vmem:[%s194_s17 + $0x38] sm:$0xff] %v308_v24 }
 0x141   : > { %620 = shalt.err (!%p617_p5)
}
 0x142   : > { %s621_s30 = scalar_lea.hbm %s894_s7, 1024  ;;  %s625_s8 = scalar_lea.hbm %s945_s2, 2048 }
 0x143   : > { %p622_p9 = scmp.ne.s32.totalorder %s894_s7, %s621_s30  ;;  %p626_p3 = scmp.lt.u32.totalorder %s894_s7, %s945_s2 }
 0x144   : > { %p627_p7 = scmp.lt.u32.totalorder %s625_s8, %s621_s30  ;;  %p629_p4 = scmp.lt.u32.totalorder %s621_s30, %s894_s7 }
 0x145   : > { %p623_p1 = pnand %p622_p9, %p816_p10 }
 0x146   : > { %p628_p13 = por %p627_p7, %p626_p3 }
 0x147   : > { %p624_p2 = pneg %p623_p1 }
 0x148   : > { %p630_p6 = por %p629_p4, %p628_p13 }
 0x14a   : > { %p631_p8 = pnand %p630_p6, %p624_p2 }
 0x14c   : > { %634 = shalt.err (!%p631_p8)
}
 0x14d   : > { %s703_s4 = smov 256   ;;  %s704_s17 = smov 16  }
 0x14e   : > { %475 = dma.vmem_to_hbm [thread:$0]  (%p816_p10), %s889_s19, 1024, %s894_s7, %s320_s12, %s703_s4, %s703_s4, %s704_s17  }
 0x14f PF: > { %s350_s21 = sand.u32 1, %s673_s9   ;;  %p963_p12 = scmp.ne.s32.totalorder %s953_s20, 0 }
 0x150   : > { %p964_p11 = scmp.ge.s32.totalorder %s693_s14, 2  ;;  %s351_s5 = scalar_lea.sflag [#allocation4], %s350_s21 }
 0x152   : > { %p486_p0 = pnand %p964_p11, %p963_p12 }
 0x154   : > { %668 = dma.done.wait (!%p486_p0), %s351_s5, 1024  }
 0x155   : > { %670 = vsyncadd (!%p486_p0), %s351_s5, 4294966272  ;;  %s19_s14 = sadd.s32 1, %s693_s14   ;;  %s965_s9 = smov %s677_s10 }
 0x156   : > { %p16_p5 = scmp.ge.s32.totalorder %s19_s14, 4   ;;  %s966_s10 = smov %s681_s11 }
 0x157   : > { %s967_s11 = smov %s825_s28  ;;  %s968_s12 = smov %s689_s13 }
 0x158   : > { %s969_s13 = smov %s971_s25  ;;  %18 = sbr.rel (!%p16_p5) target bundleno = 7 (0x7), region = 78 }
 0x15f   :  { %356 = vsyncpa [#allocation3], 1 }
 0x160   :  { %358 = vsyncpa [#allocation3 + $0x1], 1 }
 0x161   :  { %359 = vsyncpa [#allocation6], 1 }
 0x162   :  { %361 = vsyncpa [#allocation6 + $0x1], 1 }
 0x163   :  { %362 = vsyncpa [#allocation4], 1 }
 0x164   :  { %364 = vsyncpa [#allocation4 + $0x1], 1 }

</bundles_post_ra>
